<compile_context>
chip_gen: v5e
topology: v5e:2x2
jax: 0.10.0
libtpu: 0.0.40
codegen_flags: <defaults>
</compile_context>

<pallas_src>
import jax
import jax.numpy as jnp
from jax import lax
from jax.experimental import pallas as pl
from jax.experimental.pallas import tpu as pltpu


# ----------------------------------------------------------------------------- helpers
def _cdiv(a, b):
    return -(-a // b)


def _round_up(x, m):
    return _cdiv(x, m) * m


def _balanced_tiles(size, target, align):
    """Split `size` into equal tiles close to `target`, aligned to `align`.

    Returns (tile, padded_size, num_tiles) with padded_size = tile * num_tiles.
    Padding waste is at most ~num_tiles*align instead of up to (tile-1).
    """
    size_a = _round_up(max(size, 1), align)
    target = max(align, _round_up(min(target, size_a), align))
    n = _cdiv(size_a, target)
    tile = _round_up(_cdiv(size_a, n), align)
    return tile, tile * n, n


def _pad2d(a, rows, cols):
    pr, pc = rows - a.shape[0], cols - a.shape[1]
    if pr or pc:
        a = jnp.pad(a, ((0, pr), (0, pc)))
    return a


def _pad1d(a, n):
    p = n - a.shape[0]
    if p:
        a = jnp.pad(a, (0, p))
    return a


def _vmem_capacity_bytes():
    """Physical VMEM per TensorCore; conservative (v7x) fallback if unknown."""
    try:
        info = pltpu.get_tpu_info()
        v = getattr(info, "vmem_capacity_bytes", None)
        if v:
            return int(v)
    except Exception:
        pass
    return 64 * 1024 * 1024


# ----------------------------------------------------------------------------- kernels
def _linear_resident_kernel(x_ref, w_ref, b_ref, o_ref):
    # x_ref: (tm, Kp)  activations (compute dtype)
    # w_ref: (Np, Kp)  FULL weight, resident in VMEM across the whole grid
    # b_ref: (1,  Np)  bias (f32)
    # o_ref: (tm, Np)  output tile
    acc = lax.dot_general(
        x_ref[...],
        w_ref[...],
        dimension_numbers=(((1,), (1,)), ((), ())),
        preferred_element_type=jnp.float32,
    )
    o_ref[...] = (acc + b_ref[...]).astype(o_ref.dtype)


def _matmul_kernel_acc(x_ref, w_ref, b_ref, o_ref, acc_ref):
    # General tiled path with an f32 scratch accumulator (non-f32 outputs).
    k = pl.program_id(2)

    @pl.when(k == 0)
    def _():
        acc_ref[...] = jnp.zeros_like(acc_ref)

    acc_ref[...] += lax.dot_general(
        x_ref[...],
        w_ref[...],
        dimension_numbers=(((1,), (1,)), ((), ())),
        preferred_element_type=jnp.float32,
    )

    @pl.when(k == pl.num_programs(2) - 1)
    def _():
        o_ref[...] = (acc_ref[...] + b_ref[...]).astype(o_ref.dtype)


def _matmul_kernel_f32_out(x_ref, w_ref, b_ref, o_ref):
    # General tiled path, f32 output: accumulate directly into the resident
    # output block (saves tm*tn*4 B of VMEM scratch — matters most on v7x).
    k = pl.program_id(2)

    @pl.when(k == 0)
    def _():
        o_ref[...] = jnp.zeros_like(o_ref)

    o_ref[...] += lax.dot_general(
        x_ref[...],
        w_ref[...],
        dimension_numbers=(((1,), (1,)), ((), ())),
        preferred_element_type=jnp.float32,
    )

    @pl.when(k == pl.num_programs(2) - 1)
    def _():
        o_ref[...] = o_ref[...] + b_ref[...]


# ----------------------------------------------------------------------------- wrapper
def transformer_layer_forward(x, weight, bias, *, compute_dtype=jnp.bfloat16,
                              path=None):
    """nn.Linear(tea_dim, stu_dim) applied to x.

    x:      [..., tea_dim]
    weight: [stu_dim, tea_dim]   (PyTorch Linear layout; NOT pre-transposed)
    bias:   [stu_dim]
    path:   None (auto), "resident", or "general" (testing override)
    returns [..., stu_dim]  (same dtype as x)
    """
    tea_dim = x.shape[-1]
    stu_dim, w_in = weight.shape
    assert w_in == tea_dim, (weight.shape, tea_dim)
    lead = x.shape[:-1]
    out_dtype = x.dtype

    x2d = x.reshape(-1, tea_dim)
    M, K, N = x2d.shape[0], tea_dim, stu_dim

    if M == 0:
        return jnp.zeros((*lead, stu_dim), dtype=out_dtype)

    comp_bytes = jnp.dtype(compute_dtype).itemsize
    out_bytes = jnp.dtype(out_dtype).itemsize
    row_align = 16 if comp_bytes == 2 else 8

    vmem_total = _vmem_capacity_bytes()
    vmem_limit = min(vmem_total * 3 // 4, 100 * 1024 * 1024)
    big_vmem = vmem_total >= 100 * 1024 * 1024       # v5e/v6e (128 MiB) vs v7x (64 MiB)

    # ---- weight-resident feasibility --------------------------------------
    Np_min = _round_up(N, 128)
    Kp_min = _round_up(K, 128)
    w_res_bytes = Np_min * Kp_min * comp_bytes        # one copy; budget 2x below
    per_row = 2 * Kp_min * comp_bytes + 2 * Np_min * out_bytes
    remaining = vmem_limit - 2 * w_res_bytes - 2 * Np_min * 4
    tm_budget = max(0, remaining) // per_row
    fits_resident = (2 * w_res_bytes <= vmem_limit // 2) and tm_budget >= row_align

    if path == "resident":
        use_resident = True
    elif path == "general":
        use_resident = False
    else:
        use_resident = fits_resident

    if use_resident:
        # ---------------- weight-resident path: W is DMA'd exactly once ----
        Np, Kp = Np_min, Kp_min
        tm_target = max(row_align,
                        min(1024, (max(tm_budget, row_align) // row_align) * row_align))
        tm, Mp, nm = _balanced_tiles(M, tm_target, row_align)
        # Keep >=2 row blocks when possible so both v7x TensorCores get work.
        if nm == 1 and Mp >= 2 * row_align:
            tm, Mp, nm = _balanced_tiles(M, _cdiv(Mp, 2), row_align)

        x_p = _pad2d(x2d, Mp, Kp).astype(compute_dtype)
        w_p = _pad2d(weight, Np, Kp).astype(compute_dtype)
        b_p = _pad1d(bias, Np).astype(jnp.float32).reshape(1, Np)

        cost = pl.CostEstimate(
            flops=2 * M * K * N,
            transcendentals=0,
            bytes_accessed=(M * K + N * K) * comp_bytes + M * N * out_bytes + N * 4,
        )

        out = pl.pallas_call(
            _linear_resident_kernel,
            out_shape=jax.ShapeDtypeStruct((Mp, Np), out_dtype),
            grid_spec=pltpu.PrefetchScalarGridSpec(
                num_scalar_prefetch=0,
                grid=(nm,),
                in_specs=[
                    pl.BlockSpec((tm, Kp), lambda i: (i, 0)),
                    pl.BlockSpec((Np, Kp), lambda i: (0, 0)),   # constant -> resident
                    pl.BlockSpec((1, Np), lambda i: (0, 0)),
                ],
                out_specs=pl.BlockSpec((tm, Np), lambda i: (i, 0)),
            ),
            compiler_params=pltpu.CompilerParams(
                dimension_semantics=("parallel",),
                vmem_limit_bytes=int(vmem_limit),
            ),
            cost_estimate=cost,
        )(x_p, w_p, b_p)
    else:
        # ---------------- general tiled path --------------------------------
        if big_vmem:
            tm_t, tn_t, tk_t = 1024, 2048, 1024    # v5e/v6e: above both ridges
        else:
            tm_t, tn_t, tk_t = 768, 1024, 1024     # v7x: 64 MiB VMEM, ridge ~310

        tm, Mp, nm = _balanced_tiles(M, tm_t, row_align)
        tn, Np, nn = _balanced_tiles(N, tn_t, 128)
        tk, Kp, nk = _balanced_tiles(K, tk_t, 128)
        if nm == 1 and nn == 1 and Mp >= 2 * row_align:
            tm, Mp, nm = _balanced_tiles(M, _cdiv(Mp, 2), row_align)

        x_p = _pad2d(x2d, Mp, Kp).astype(compute_dtype)
        w_p = _pad2d(weight, Np, Kp).astype(compute_dtype)
        b_p = _pad1d(bias, Np).astype(jnp.float32).reshape(1, Np)

        cost = pl.CostEstimate(
            flops=2 * M * K * N,
            transcendentals=0,
            bytes_accessed=M * K * comp_bytes * nn + N * K * comp_bytes * nm
            + M * N * out_bytes + N * 4,
        )

        if out_dtype == jnp.float32:
            kernel = _matmul_kernel_f32_out
            scratch = []
        else:
            kernel = _matmul_kernel_acc
            scratch = [pltpu.VMEM((tm, tn), jnp.float32)]

        out = pl.pallas_call(
            kernel,
            out_shape=jax.ShapeDtypeStruct((Mp, Np), out_dtype),
            grid_spec=pltpu.PrefetchScalarGridSpec(
                num_scalar_prefetch=0,
                grid=(nm, nn, nk),
                in_specs=[
                    pl.BlockSpec((tm, tk), lambda i, j, k: (i, k)),
                    pl.BlockSpec((tn, tk), lambda i, j, k: (j, k)),
                    pl.BlockSpec((1, tn), lambda i, j, k: (0, j)),
                ],
                out_specs=pl.BlockSpec((tm, tn), lambda i, j, k: (i, j)),
                scratch_shapes=scratch,
            ),
            compiler_params=pltpu.CompilerParams(
                dimension_semantics=("parallel", "parallel", "arbitrary"),
                vmem_limit_bytes=int(vmem_limit),
            ),
            cost_estimate=cost,
        )(x_p, w_p, b_p)

    out = out[:M, :N]
    return out.reshape(*lead, stu_dim)


# ----------------------------------------------------------------------------- demo
if __name__ == "__main__":
    key = jax.random.PRNGKey(0)
    k_x, k_w, k_b = jax.random.split(key, 3)

    batch, seq = 2, 8
    tea_dim, stu_dim = 32, 64

    x = jax.random.normal(k_x, (batch, seq, tea_dim), dtype=jnp.float32)
    # Deterministic synthetic params (shapes match nn.Linear(tea_dim, stu_dim)).
    weight = jax.random.normal(k_w, (stu_dim, tea_dim), dtype=jnp.float32) * 0.05
    bias = jax.random.normal(k_b, (stu_dim,), dtype=jnp.float32) * 0.05

    y_ref = x @ weight.T + bias

    # Auto path (weight-resident for this size).
    y = transformer_layer_forward(x, weight, bias)
    jax.block_until_ready(y)
    assert y.shape == (batch, seq, stu_dim)
    assert y.dtype == x.dtype
    assert jnp.allclose(y, y_ref, atol=3e-2, rtol=3e-2), float(
        jnp.max(jnp.abs(y - y_ref)))

    # Forced general (tiled K-reduction) path; f32 output -> direct-accumulate kernel.
    y_g = transformer_layer_forward(x, weight, bias, path="general")
    jax.block_until_ready(y_g)
    assert jnp.allclose(y_g, y_ref, atol=3e-2, rtol=3e-2), float(
        jnp.max(jnp.abs(y_g - y_ref)))

    # Forced general path with bf16 activations/output -> scratch-accumulator kernel.
    y_b = transformer_layer_forward(x.astype(jnp.bfloat16), weight, bias,
                                    path="general")
    jax.block_until_ready(y_b)
    assert y_b.dtype == jnp.bfloat16
    assert jnp.allclose(y_b.astype(jnp.float32), y_ref, atol=6e-2, rtol=6e-2), float(
        jnp.max(jnp.abs(y_b.astype(jnp.float32) - y_ref)))

    print("KERNEL_OK")
</pallas_src>

<mosaic_0001>
module attributes {stable_mosaic.version = 11 : i64} {
  func.func @_linear_resident_kernel(%arg0: i32, %arg1: memref<16x128xbf16, #tpu.memory_space<vmem>>, %arg2: memref<128x128xbf16, #tpu.memory_space<vmem>>, %arg3: memref<1x128xf32, #tpu.memory_space<vmem>>, %arg4: memref<16x128xf32, #tpu.memory_space<vmem>>) attributes {dimension_semantics = [#tpu.dimension_semantics<parallel>], iteration_bounds = array<i64: 1>, scalar_prefetch = 0 : i64, scratch_operands = 0 : i64, tpu.core_type = #tpu.core_type<tc>, window_params = [{transform_indices = @transform_0, window_bounds = array<i64: 16, 128>}, {pipeline_mode = #tpu.pipeline_mode<synchronous>, transform_indices = @transform_1, window_bounds = array<i64: 128, 128>}, {pipeline_mode = #tpu.pipeline_mode<synchronous>, transform_indices = @transform_2, window_bounds = array<i64: 1, 128>}, {transform_indices = @transform_3, window_bounds = array<i64: 16, 128>}]} {
    %c0 = arith.constant 0 : index
    %c0_0 = arith.constant 0 : index
    %0 = vector.load %arg1[%c0, %c0_0] : memref<16x128xbf16, #tpu.memory_space<vmem>>, vector<16x128xbf16>
    %c0_1 = arith.constant 0 : index
    %c0_2 = arith.constant 0 : index
    %1 = vector.load %arg2[%c0_1, %c0_2] : memref<128x128xbf16, #tpu.memory_space<vmem>>, vector<128x128xbf16>
    %cst = arith.constant dense<0.000000e+00> : vector<16x128xf32>
    %2 = tpu.matmul %0, %1, %cst {dimension_numbers = #tpu.dot_dimension_numbers<[1], [1], [0], [0], [0, 0, 1, 0], [], []>} : vector<16x128xbf16>, vector<128x128xbf16>, vector<16x128xf32> -> vector<16x128xf32>
    %c0_3 = arith.constant 0 : index
    %c0_4 = arith.constant 0 : index
    %3 = vector.load %arg3[%c0_3, %c0_4] : memref<1x128xf32, #tpu.memory_space<vmem>>, vector<1x128xf32>
    %4 = vector.broadcast %3 : vector<1x128xf32> to vector<16x128xf32>
    %5 = arith.addf %2, %4 : vector<16x128xf32>
    %c0_5 = arith.constant 0 : index
    %c0_6 = arith.constant 0 : index
    %6 = vector.load %arg4[%c0_5, %c0_6] : memref<16x128xf32, #tpu.memory_space<vmem>>, vector<16x128xf32>
    tpu.vector_store %arg4[%c0_5, %c0_6], %5 {strides = array<i32>} : memref<16x128xf32, #tpu.memory_space<vmem>>, vector<16x128xf32>,
    return
  }
  func.func @transform_0(%arg0: i32) -> (i32, i32) {
    %c0_i32 = arith.constant 0 : i32
    %c0_i32_0 = arith.constant 0 : i32
    return %arg0, %c0_i32 : i32, i32
  }
  func.func @transform_1(%arg0: i32) -> (i32, i32) {
    %c0_i32 = arith.constant 0 : i32
    %c0_i32_0 = arith.constant 0 : i32
    %c0_i32_1 = arith.constant 0 : i32
    return %c0_i32, %c0_i32_0 : i32, i32
  }
  func.func @transform_2(%arg0: i32) -> (i32, i32) {
    %c0_i32 = arith.constant 0 : i32
    %c0_i32_0 = arith.constant 0 : i32
    %c0_i32_1 = arith.constant 0 : i32
    return %c0_i32, %c0_i32_0 : i32, i32
  }
  func.func @transform_3(%arg0: i32) -> (i32, i32) {
    %c0_i32 = arith.constant 0 : i32
    %c0_i32_0 = arith.constant 0 : i32
    return %arg0, %c0_i32 : i32, i32
  }
}

</mosaic_0001>

<bundles_post_ra>
// kernel: tpu_custom_call.1
= control target key start
LH: loop header
LB: loop body
LE: loop exit
PB: predicated region body
PF: predicated region fallthrough
CT: control target
= control target key end

     0   :  { %8 = vsyncpa [#allocation3], 0  ;;  %s329_s0 = inlined_call_operand.hbm [shape: bf16[16,128], index: 0, kind: input, shape index: {}]   ;;  %s330_s1 = inlined_call_operand.hbm [shape: bf16[128,128], index: 1, kind: input, shape index: {}]   ;;  %s331_s2 = inlined_call_operand.vmem [shape: f32[1,128], index: 2, kind: input, shape index: {}]   ;;  %s332_s3 = inlined_call_operand.hbm [shape: f32[16,128], index: 3, kind: output, shape index: {}]  }
   0x1   :  { %9 = vsyncpa [#allocation6], 0 }
   0x2   :  { %10 = vsyncpa [#allocation4], 0  ;;  %s15_s14 = sshll.u32 %s329_s0, 4  ;;  %s290_s15 = smov [#allocation2]   ;;  %s16_s14 = int_to_ptr.hbm [resolvable:$true] %s15_s14 }
   0x3   :  { %s17_s16 = sshll.u32 %s290_s15, 4  ;;  %s28_s19 = sshll.u32 %s330_s1, 4  ;;  %s18_s16 = int_to_ptr.vmem [resolvable:$true] %s17_s16  ;;  %s29_s19 = int_to_ptr.hbm [resolvable:$true] %s28_s19 }
   0x4   :  { %s291_s20 = smov 64   ;;  %s292_s21 = smov 4  }
   0x5   :  { %23 = dma.hbm_to_vmem [thread:$0]  %s16_s14, 128, %s18_s16, [#allocation3], %s291_s20, %s291_s20, %s292_s21  }
   0x6   :  { %s293_s22 = smov [#allocation5]  }
   0x7   :  { %s30_s23 = sshll.u32 %s293_s22, 4  ;;  %s31_s23 = int_to_ptr.vmem [resolvable:$true] %s30_s23 }
   0x8   :  { %36 = dma.hbm_to_vmem [thread:$0]  %s29_s19, 1024, %s31_s23, [#allocation6], %s291_s20, %s291_s20, %s292_s21  }
   0x9   :  { %284 = dma.done.wait [#allocation3], 128  }
   0xa   :  { %285 = vsyncadd [#allocation3], 4294967168 }
   0xb   :  { %286 = dma.done.wait [#allocation6], 1024  }
   0xc   :  { %287 = vsyncadd [#allocation6], 4294966272  ;;  %v203_v0 = vld [vmem:[#allocation5 + $0x38] sm:$0xff]  ;;  %v202_v1 = vld [vmem:[#allocation5 + $0x30] sm:$0xff]  ;;  %s294_s24 = smov [#allocation7]   ;;  %s145_s28 = sshll.u32 %s332_s3, 4  ;;  %s146_s28 = int_to_ptr.hbm [resolvable:$true] %s145_s28 }
   0xd   :  { %123 = vmatpush.bf16.xpose.msra.mxu0 %v203_v0  ;;  %v201_v2 = vld [vmem:[#allocation5 + $0x28] sm:$0xff]  ;;  %v200_v3 = vld [vmem:[#allocation5 + $0x20] sm:$0xff]  ;;  %v199_v4 = vld [vmem:[#allocation5 + $0x18] sm:$0xff]  ;;  %s143_s25 = sshll.u32 %s294_s24, 4  ;;  %s295_s29 = smov 128   ;;  %s144_s25 = int_to_ptr.vmem [resolvable:$true] %s143_s25 }
   0xe   :  { %v198_v5 = vld [vmem:[#allocation5 + $0x10] sm:$0xff]  ;;  %v197_v6 = vld [vmem:[#allocation5 + $0x8] sm:$0xff]  ;;  %v196_v7 = vld [vmem:[#allocation5] sm:$0xff]  ;;  %s296_s30 = smov 8  }
   0xf   :  { %v195_v8 = vld [vmem:[#allocation2] sm:$0xff] }
  0x10   :  { %v211_v9 = vld [vmem:[%s331_s2] ss:$0 sm:$0xff] }
  0x15   :  { %124 = vmatpush.bf16.xpose.msra.mxu0 %v202_v1 }
  0x1d   :  { %125 = vmatpush.bf16.xpose.msra.mxu0 %v201_v2 }
  0x25   :  { %126 = vmatpush.bf16.xpose.msra.mxu0 %v200_v3 }
  0x2d   :  { %127 = vmatpush.bf16.xpose.msra.mxu0 %v199_v4 }
  0x35   :  { %128 = vmatpush.bf16.xpose.msra.mxu0 %v198_v5 }
  0x3d   :  { %129 = vmatpush.bf16.xpose.msra.mxu0 %v197_v6 }
  0x45   :  { %130 = vmatpush.bf16.xpose.msra.mxu0 %v196_v7 }
  0x4c   :  { %131 = vmatmul.bf16.vlgmr.msra.gmra.mxu0 %v195_v8 }
  0xc9   :  { %v132_v10 = vpop.f32.mrf.mxu0 }
  0xca   :  { %v133_v11 = vadd.f32 %v211_v9, %v132_v10 }
  0xcc   :  { %137 = vst [vmem:[#allocation7] sm:$0xff] %v133_v11 }
  0xd1   :  { %v134_v12 = vpop.f32.mrf.mxu0 }
  0xd2   :  { %v135_v13 = vadd.f32 %v211_v9, %v134_v12 }
  0xd4   :  { %138 = vst [vmem:[#allocation7 + $0x8] sm:$0xff] %v135_v13 }
  0xd5   :  { %151 = dma.vmem_to_hbm [thread:$0]  %s144_s25, 256, %s146_s28, [#allocation4], %s295_s29, %s295_s29, %s296_s30  }
  0xd6   :  { %288 = dma.done.wait [#allocation4], 256  }
  0xd7   :  { %289 = vsyncadd [#allocation4], 4294967040 }
  0xd8   :  { %156 = vsyncpa [#allocation3], 1 }
  0xd9   :  { %157 = vsyncpa [#allocation6], 1 }
  0xda   :  { %158 = vsyncpa [#allocation4], 1 }

</bundles_post_ra>
